<compile_context>
chip_gen: v7x
topology: tpu7x:2x2x1
jax: 0.10.0
libtpu: 0.0.40
codegen_flags: <defaults>
</compile_context>

<pallas_src>
import functools

import jax
import jax.numpy as jnp
from jax.experimental import pallas as pl
from jax.experimental.pallas import tpu as pltpu


# ----------------------------------------------------------------------------
# Kernel
# ----------------------------------------------------------------------------
def channel_attention_kernel(x_ref, w1_ref, b1_ref, w2_ref, b2_ref,
                             out_ref, acc_ref, *, inv_hw):
    # x_ref : [B, tile_hw, 512]  one spatial tile, channels on lanes
    # acc   : [B, 512]           GAP accumulator (persists across the grid)
    t = pl.program_id(0)

    @pl.when(t == 0)
    def _():
        acc_ref[...] = jnp.zeros_like(acc_ref)

    # Partial global-average-pool: per-channel sum over this tile's rows.
    acc_ref[...] += jnp.sum(x_ref[...].astype(jnp.float32), axis=1)

    @pl.when(t == pl.num_programs(0) - 1)
    def _():
        g = acc_ref[...] * inv_hw                                    # [B, 512]
        a = jnp.dot(g, w1_ref[...], preferred_element_type=jnp.float32)
        a = jnp.maximum(a + b1_ref[...], 0.0)          # Linear + BN(folded) + ReLU
        y = jnp.dot(a, w2_ref[...], preferred_element_type=jnp.float32)
        y = jax.nn.sigmoid(y + b2_ref[...])            # Linear + Sigmoid
        out_ref[...] = (g * y).astype(out_ref.dtype)   # out = gap * attention


# ----------------------------------------------------------------------------
# pallas_call wrapper
# ----------------------------------------------------------------------------
def _round_up(x, m):
    return (x + m - 1) // m * m


def channel_attention(sa_nchw, params, *, tile_hw=512):
    """ChannelAttention forward. sa_nchw: [B, 512, H, W] -> [B, 512]."""
    B, C, H, W = sa_nchw.shape
    hw = H * W

    # Layout glue only: NCHW -> [B, H*W, C], channels on TPU lanes.
    x = jnp.transpose(sa_nchw, (0, 2, 3, 1)).reshape(B, hw, C)

    # Spatial tile must be a multiple of 8 sublanes; zero-pad extra rows
    # (zeros do not change the pooled sum -- we divide by the true H*W).
    tile_hw = min(tile_hw, _round_up(hw, 8))
    hw_pad = _round_up(hw, tile_hw)
    if hw_pad != hw:
        x = jnp.pad(x, ((0, 0), (0, hw_pad - hw), (0, 0)))
    grid = (hw_pad // tile_hw,)

    kernel = functools.partial(channel_attention_kernel, inv_hw=1.0 / float(hw))
    return pl.pallas_call(
        kernel,
        grid=grid,
        in_specs=[
            pl.BlockSpec((B, tile_hw, C), lambda t: (0, t, 0)),
            pl.BlockSpec(params["w1"].shape, lambda t: (0, 0)),
            pl.BlockSpec(params["b1"].shape, lambda t: (0, 0)),
            pl.BlockSpec(params["w2"].shape, lambda t: (0, 0)),
            pl.BlockSpec(params["b2"].shape, lambda t: (0, 0)),
        ],
        out_specs=pl.BlockSpec((B, C), lambda t: (0, 0)),
        out_shape=jax.ShapeDtypeStruct((B, C), jnp.float32),
        scratch_shapes=[pltpu.VMEM((B, C), jnp.float32)],
        compiler_params=pltpu.CompilerParams(
            dimension_semantics=("arbitrary",)),     # spatial axis is a reduction
    )(x, params["w1"], params["b1"], params["w2"], params["b2"])


# ----------------------------------------------------------------------------
# Parameters (PyTorch Linear default init, eval-mode BN folded into Linear #1)
# ----------------------------------------------------------------------------
def init_params(key, c=512, hidden=32):
    kw1, kb1, kw2, kb2 = jax.random.split(key, 4)
    lim1 = 1.0 / c ** 0.5
    lim2 = 1.0 / hidden ** 0.5
    w1 = jax.random.uniform(kw1, (c, hidden), jnp.float32, -lim1, lim1)
    b1 = jax.random.uniform(kb1, (1, hidden), jnp.float32, -lim1, lim1)
    w2 = jax.random.uniform(kw2, (hidden, c), jnp.float32, -lim2, lim2)
    b2 = jax.random.uniform(kb2, (1, c), jnp.float32, -lim2, lim2)
    # Fold eval-mode BatchNorm1d(32) (mean=0, var=1, gamma=1, beta=0, eps=1e-5)
    # into the first Linear as a per-feature scale.
    bn_scale = 1.0 / jnp.sqrt(jnp.float32(1.0 + 1e-5))
    return {"w1": w1 * bn_scale, "b1": b1 * bn_scale, "w2": w2, "b2": b2}


def channel_attention_ref(sa_nchw, params):
    """Pure-JAX reference of the same (BN-folded, eval-mode) forward."""
    g = jnp.mean(sa_nchw, axis=(2, 3))                       # [B, 512]
    a = jnp.maximum(g @ params["w1"] + params["b1"], 0.0)
    y = jax.nn.sigmoid(a @ params["w2"] + params["b2"])
    return g * y


if __name__ == "__main__":
    B, C, H, W = 2, 512, 16, 16      # channel dim fixed at 512 by Linear(512, 32)

    key = jax.random.PRNGKey(0)
    kp, kx = jax.random.split(key)
    params = init_params(kp)
    sa = jax.random.normal(kx, (B, C, H, W), jnp.float32)

    # tile_hw=128 -> 2 spatial tiles, exercising the accumulator / pl.when path.
    out = channel_attention(sa, params, tile_hw=128)
    jax.block_until_ready(out)
    assert out.shape == (B, C)

    ref = channel_attention_ref(sa, params)
    max_err = float(jnp.max(jnp.abs(out - ref)))
    assert jnp.allclose(out, ref, rtol=1e-4, atol=1e-5), max_err

    print("KERNEL_OK")
</pallas_src>

<mosaic_0001>
module attributes {stable_mosaic.version = 11 : i64} {
  func.func @channel_attention_kernel(%arg0: i32, %arg1: memref<2x128x512xf32, #tpu.memory_space<vmem>>, %arg2: memref<512x32xf32, #tpu.memory_space<vmem>>, %arg3: memref<1x32xf32, #tpu.memory_space<vmem>>, %arg4: memref<32x512xf32, #tpu.memory_space<vmem>>, %arg5: memref<1x512xf32, #tpu.memory_space<vmem>>, %arg6: memref<2x512xf32, #tpu.memory_space<vmem>>, %arg7: memref<2x512xf32, #tpu.memory_space<vmem>>) attributes {dimension_semantics = [#tpu.dimension_semantics<arbitrary>], iteration_bounds = array<i64: 2>, scalar_prefetch = 0 : i64, scratch_operands = 1 : i64, tpu.core_type = #tpu.core_type<tc>, window_params = [{transform_indices = @transform_0, window_bounds = array<i64: 2, 128, 512>}, {pipeline_mode = #tpu.pipeline_mode<synchronous>, transform_indices = @transform_1, window_bounds = array<i64: 512, 32>}, {pipeline_mode = #tpu.pipeline_mode<synchronous>, transform_indices = @transform_2, window_bounds = array<i64: 1, 32>}, {pipeline_mode = #tpu.pipeline_mode<synchronous>, transform_indices = @transform_3, window_bounds = array<i64: 32, 512>}, {pipeline_mode = #tpu.pipeline_mode<synchronous>, transform_indices = @transform_4, window_bounds = array<i64: 1, 512>}, {pipeline_mode = #tpu.pipeline_mode<synchronous>, transform_indices = @transform_5, window_bounds = array<i64: 2, 512>}]} {
    %c0_i32 = arith.constant 0 : i32
    %0 = arith.cmpi eq, %arg0, %c0_i32 : i32
    %1 = arith.extui %0 : i1 to i32
    %c0_i32_0 = arith.constant 0 : i32
    %2 = arith.cmpi ne, %1, %c0_i32_0 : i32
    scf.if %2 {
      %cst_8 = arith.constant 0.000000e+00 : f32
      %11 = vector.broadcast %cst_8 : f32 to vector<2x512xf32>
      %c0_9 = arith.constant 0 : index
      %c0_10 = arith.constant 0 : index
      %12 = vector.load %arg7[%c0_9, %c0_10] : memref<2x512xf32, #tpu.memory_space<vmem>>, vector<2x512xf32>
      tpu.vector_store %arg7[%c0_9, %c0_10], %11 {strides = array<i32>} : memref<2x512xf32, #tpu.memory_space<vmem>>, vector<2x512xf32>,
    } else {
    }
    %c0 = arith.constant 0 : index
    %c0_1 = arith.constant 0 : index
    %3 = vector.load %arg7[%c0, %c0_1] : memref<2x512xf32, #tpu.memory_space<vmem>>, vector<2x512xf32>
    %c0_2 = arith.constant 0 : index
    %c0_3 = arith.constant 0 : index
    %c0_4 = arith.constant 0 : index
    %4 = vector.load %arg1[%c0_2, %c0_3, %c0_4] : memref<2x128x512xf32, #tpu.memory_space<vmem>>, vector<2x128x512xf32>
    %cst = arith.constant dense<0.000000e+00> : vector<2x512xf32>
    %5 = vector.multi_reduction <add>, %4, %cst [1] : vector<2x128x512xf32> to vector<2x512xf32>
    %6 = arith.addf %3, %5 : vector<2x512xf32>
    %c0_5 = arith.constant 0 : index
    %c0_6 = arith.constant 0 : index
    %7 = vector.load %arg7[%c0_5, %c0_6] : memref<2x512xf32, #tpu.memory_space<vmem>>, vector<2x512xf32>
    tpu.vector_store %arg7[%c0_5, %c0_6], %6 {strides = array<i32>} : memref<2x512xf32, #tpu.memory_space<vmem>>, vector<2x512xf32>,
    %c1_i32 = arith.constant 1 : i32
    %8 = arith.cmpi eq, %arg0, %c1_i32 : i32
    %9 = arith.extui %8 : i1 to i32
    %c0_i32_7 = arith.constant 0 : i32
    %10 = arith.cmpi ne, %9, %c0_i32_7 : i32
    scf.if %10 {
      %c0_8 = arith.constant 0 : index
      %c0_9 = arith.constant 0 : index
      %11 = vector.load %arg7[%c0_8, %c0_9] : memref<2x512xf32, #tpu.memory_space<vmem>>, vector<2x512xf32>
      %cst_10 = arith.constant 3.906250e-03 : f32
      %12 = vector.broadcast %cst_10 : f32 to vector<2x512xf32>
      %13 = arith.mulf %11, %12 : vector<2x512xf32>
      %c0_11 = arith.constant 0 : index
      %c0_12 = arith.constant 0 : index
      %14 = vector.load %arg2[%c0_11, %c0_12] : memref<512x32xf32, #tpu.memory_space<vmem>>, vector<512x32xf32>
      %cst_13 = arith.constant dense<0.000000e+00> : vector<2x32xf32>
      %15 = tpu.matmul %13, %14, %cst_13 {dimension_numbers = #tpu.dot_dimension_numbers<[1], [0], [0], [1], [0, 0, 1, 1], [], []>} : vector<2x512xf32>, vector<512x32xf32>, vector<2x32xf32> -> vector<2x32xf32>
      %c0_14 = arith.constant 0 : index
      %c0_15 = arith.constant 0 : index
      %16 = vector.load %arg3[%c0_14, %c0_15] : memref<1x32xf32, #tpu.memory_space<vmem>>, vector<1x32xf32>
      %17 = vector.broadcast %16 : vector<1x32xf32> to vector<2x32xf32>
      %18 = arith.addf %15, %17 : vector<2x32xf32>
      %cst_16 = arith.constant 0.000000e+00 : f32
      %19 = vector.broadcast %cst_16 : f32 to vector<2x32xf32>
      %20 = arith.maximumf %18, %19 : vector<2x32xf32>
      %c0_17 = arith.constant 0 : index
      %c0_18 = arith.constant 0 : index
      %21 = vector.load %arg4[%c0_17, %c0_18] : memref<32x512xf32, #tpu.memory_space<vmem>>, vector<32x512xf32>
      %cst_19 = arith.constant dense<0.000000e+00> : vector<2x512xf32>
      %22 = tpu.matmul %20, %21, %cst_19 {dimension_numbers = #tpu.dot_dimension_numbers<[1], [0], [0], [1], [0, 0, 1, 1], [], []>} : vector<2x32xf32>, vector<32x512xf32>, vector<2x512xf32> -> vector<2x512xf32>
      %c0_20 = arith.constant 0 : index
      %c0_21 = arith.constant 0 : index
      %23 = vector.load %arg5[%c0_20, %c0_21] : memref<1x512xf32, #tpu.memory_space<vmem>>, vector<1x512xf32>
      %24 = vector.broadcast %23 : vector<1x512xf32> to vector<2x512xf32>
      %25 = arith.addf %22, %24 : vector<2x512xf32>
      %26 = arith.negf %25 : vector<2x512xf32>
      %27 = math.exp %26 : vector<2x512xf32>
      %cst_22 = arith.constant 1.000000e+00 : f32
      %28 = vector.broadcast %cst_22 : f32 to vector<2x512xf32>
      %29 = arith.addf %28, %27 : vector<2x512xf32>
      %30 = arith.divf %28, %29 : vector<2x512xf32>
      %31 = arith.mulf %13, %30 : vector<2x512xf32>
      %c0_23 = arith.constant 0 : index
      %c0_24 = arith.constant 0 : index
      %32 = vector.load %arg6[%c0_23, %c0_24] : memref<2x512xf32, #tpu.memory_space<vmem>>, vector<2x512xf32>
      tpu.vector_store %arg6[%c0_23, %c0_24], %31 {strides = array<i32>} : memref<2x512xf32, #tpu.memory_space<vmem>>, vector<2x512xf32>,
    } else {
    }
    return
  }
  func.func @transform_0(%arg0: i32) -> (i32, i32, i32) {
    %c0_i32 = arith.constant 0 : i32
    %c0_i32_0 = arith.constant 0 : i32
    %c0_i32_1 = arith.constant 0 : i32
    return %c0_i32, %arg0, %c0_i32_0 : i32, i32, i32
  }
  func.func @transform_1(%arg0: i32) -> (i32, i32) {
    %c0_i32 = arith.constant 0 : i32
    %c0_i32_0 = arith.constant 0 : i32
    %c0_i32_1 = arith.constant 0 : i32
    return %c0_i32, %c0_i32_0 : i32, i32
  }
  func.func @transform_2(%arg0: i32) -> (i32, i32) {
    %c0_i32 = arith.constant 0 : i32
    %c0_i32_0 = arith.constant 0 : i32
    %c0_i32_1 = arith.constant 0 : i32
    return %c0_i32, %c0_i32_0 : i32, i32
  }
  func.func @transform_3(%arg0: i32) -> (i32, i32) {
    %c0_i32 = arith.constant 0 : i32
    %c0_i32_0 = arith.constant 0 : i32
    %c0_i32_1 = arith.constant 0 : i32
    return %c0_i32, %c0_i32_0 : i32, i32
  }
  func.func @transform_4(%arg0: i32) -> (i32, i32) {
    %c0_i32 = arith.constant 0 : i32
    %c0_i32_0 = arith.constant 0 : i32
    %c0_i32_1 = arith.constant 0 : i32
    return %c0_i32, %c0_i32_0 : i32, i32
  }
  func.func @transform_5(%arg0: i32) -> (i32, i32) {
    %c0_i32 = arith.constant 0 : i32
    %c0_i32_0 = arith.constant 0 : i32
    %c0_i32_1 = arith.constant 0 : i32
    return %c0_i32, %c0_i32_0 : i32, i32
  }
}

</mosaic_0001>

<bundles_post_ra>
// kernel: tpu_custom_call.1
= control target key start
LH: loop header
LB: loop body
LE: loop exit
PB: predicated region body
PF: predicated region fallthrough
CT: control target
= control target key end

     0   :  { %10 = vsyncpa [#allocation4], 0  ;;  %s2011_s0 = inlined_call_operand.hbm [shape: f32[2,256,512], index: 0, kind: input, shape index: {}]   ;;  %s2012_s1 = inlined_call_operand.vmem [shape: f32[512,32], index: 1, kind: input, shape index: {}]   ;;  %s2013_s2 = inlined_call_operand.vmem [shape: f32[1,32], index: 2, kind: input, shape index: {}]   ;;  %s2014_s3 = inlined_call_operand.vmem [shape: f32[32,512], index: 3, kind: input, shape index: {}]   ;;  %s2015_s4 = inlined_call_operand.vmem [shape: f32[1,512], index: 4, kind: input, shape index: {}]   ;;  %s2016_s5 = inlined_call_operand.hbm [shape: f32[2,512], index: 5, kind: output, shape index: {}]  }
   0x1   :  { %12 = vsyncpa [#allocation4 + $0x1], 0 }
   0x2   :  { %13 = vsyncpa [#allocation5], 0  ;;  %s1502_s18 = smov 0   ;;  %s1504_s19 = smov 0  }
   0x3   :  { %s1506_s20 = smov 0   ;;  %s1508_s21 = smov 0  }
   0x4 LB: > { %s1521_s22 = sadd.s32 4294967295, %s1460_s21   ;;  %s1524_s23 = sadd.s32 1, %s1460_s21   ;;  %s1460_s21 = sphi %s1508_s21, %s2022_s21   ;;  %s1456_s20 = sphi %s1506_s20, %s2021_s20   ;;  %s1452_s19 = sphi %s1504_s19, %s2020_s19   ;;  %s1448_s18 = sphi %s1502_s18, %s2019_s18  }
   0x5   : > { %s23_s24 = ssub.s32 %s1460_s21, %s1524_s23  ;;  %s26_s25 = sadd.s32 1, %s1456_s20 }
   0x6   : > { %p24_p0 = scmp.eq.s32.totalorder %s23_s24, 0  ;;  %p33_p1 = scmp.ne.s32.totalorder %s1456_s20, %s1452_s19 }
   0x7   : > { %p34_p2 = scmp.eq.s32.totalorder %s1460_s21, 0  ;;  %p39_p3 = scmp.ne.s32.totalorder %s1452_s19, %s1448_s18 }
   0x8   : > { %s1534_s26 = scalar_select %p24_p0, %s1456_s20, %s26_s25  }
   0x9   : > { %p1536_p4 = por %p34_p2, %p33_p1  ;;  %p40_p5 = scmp.eq.s32.totalorder %s1521_s22, 0 }
   0xa   : > { %p1149_p7 = scmp.ge.s32.totalorder %s1460_s21, 2 }
   0xb   : > { %p1541_p6 = por %p40_p5, %p39_p3 }
   0xc   : > { %176 = sbr.rel (%p1149_p7) target bundleno = 32 (0x20), region = 32 }
  0x13   : > { %s180_s29 = sand.u32 1, %s1456_s20   ;;  %s1172_s30 = sshll.u32 %s1460_s21, 13 }
  0x14   : > { %s1150_s6 = sshll.u32 %s180_s29, 10  ;;  %s191_s9 = scalar_lea.hbm %s2011_s0, %s1172_s30 }
  0x15   : > { %s1323_s10 = scalar_select %p1536_p4, [#allocation0], [#allocation9] }
  0x16   : > { %s184_s11 = scalar_lea.vmem [#allocation3], %s1150_s6  ;;  %s1462_s14 = smov 16384  }
  0x17   : > { %s204_s12 = sshll.u32 %s184_s11, 4  ;;  %s196_s13 = sld [smem:[%s1323_s10]]   ;;  %s205_s12 = int_to_ptr.vmem [resolvable:$true] %s204_s12 }
  0x18   : > { %1324 = sst [smem:[#allocation8]] (%p1536_p4), %s1462_s14  ;;  %s1463_s15 = smov 8192  }
  0x19   : > { %1325 = sst [smem:[#allocation8 + $0x1]] (%p1536_p4), %s1463_s15  ;;  %s1464_s16 = smov 16  }
  0x1a   : > { %1326 = sst [smem:[#allocation8 + $0x2]] (%p1536_p4), %s1464_s16  ;;  %s1465_s17 = smov 512  }
  0x1b   : > { %1327 = sst [smem:[#allocation8 + $0x3]] (%p1536_p4), %s1465_s17  ;;  %s1466_s24 = smov 32  }
  0x1c   : > { %1328 = sst [smem:[#allocation8 + $0x4]] (%p1536_p4), %s1465_s17  ;;  %s181_s30 = scalar_lea.sflag [#allocation4], %s180_s29 }
  0x1d   : > { %s1154_s18 = sshll.u32 %s196_s13, 26  ;;  %1329 = sst [smem:[#allocation8 + $0x5]] (%p1536_p4), %s1466_s24 }
  0x1e   : > { %s1155_s25 = sadd.s32 134217728, %s1154_s18  ;;  %s1467_s6 = smov [#allocation7]  }
  0x1f   : > { %1330 = dma.general (%p1536_p4), %s191_s9, 16384, %s205_s12, %s181_s30, %s1467_s6, [#allocation8], %s1155_s25, 0  }
  0x20 PF: > { %p1156_p8 = scmp.ge.s32.totalorder %s1460_s21, 1  ;;  %p225_p9 = scmp.lt.s32.totalorder %s1460_s21, 3 }
  0x22   : > { %p226_p10 = pnand %p1156_p8, %p225_p9 }
  0x23   : > { %s231_s7 = sand.u32 (!%p226_p10), 1, %s1452_s19  }
  0x24   : > { %229 = sbr.rel (%p226_p10) target bundleno = 644 (0x284), region = 40  ;;  %s1157_s8 = sshll.u32 (!%p226_p10), %s231_s7, 10 }
  0x25   : > { %s232_s10 = scalar_lea.sflag (!%p226_p10), [#allocation4], %s231_s7  ;;  %s1570_s11 = scalar_lea.vmem (!%p226_p10), [#allocation3], %s1157_s8 }
  0x2b   : > { %1439 = dma.done.wait (%p1541_p6), %s232_s10, 16384  }
  0x2c   : > { %1441 = vsyncadd (%p1541_p6), %s232_s10, 4294950912  ;;  %p1158_p11 = scmp.ne.s32.totalorder %s1521_s22, 0 }
  0x2d   : > { %v1468_v0 = vmov (!%p1158_p11), 0.0  }
  0x2e   : > { %261 = sbr.rel (%p1158_p11) target bundleno = 53 (0x35), region = 48  ;;  %262 = vst [vmem:[#allocation2] sm:$0xff] (!%p1158_p11), %v1468_v0 }
  0x35 PF: > { %v264_v1 = vld [vmem:[%s1570_s11] sm:$0xff]  ;;  %v265_v2 = vld [vmem:[%s1570_s11 + $0x8] sm:$0xff]  ;;  %v266_v3 = vld [vmem:[%s1570_s11 + $0x10] sm:$0xff]  ;;  %vm607_vm0 = vcmask 1041409   ;;  %vm609_vm1 = vcmask 1043459   ;;  %vm611_vm2 = vcmask 1045509  }
  0x36   : > { %v267_v4 = vld [vmem:[%s1570_s11 + $0x18] sm:$0xff]  ;;  %v268_v5 = vld [vmem:[%s1570_s11 + $0x20] sm:$0xff]  ;;  %v269_v6 = vld [vmem:[%s1570_s11 + $0x28] sm:$0xff]  ;;  %vm613_vm3 = vcmask 1047559   ;;  %p1159_p12 = scmp.ne.s32.totalorder %s1521_s22, 1 }
  0x37   : > { %v270_v7 = vld [vmem:[%s1570_s11 + $0x30] sm:$0xff]  ;;  %v271_v8 = vld [vmem:[%s1570_s11 + $0x38] sm:$0xff]  ;;  %v392_v9 = vadd.f32 %v268_v5, %v264_v1  ;;  %v272_v10 = vld [vmem:[%s1570_s11 + $0x40] sm:$0xff]  ;;  %v413_v13 = vadd.f32 %v269_v6, %v265_v2  ;;  %vm896_vm4 = vcmask (!%p1159_p12), 261120  }
  0x38   : > { %v273_v11 = vld [vmem:[%s1570_s11 + $0x48] sm:$0xff]  ;;  %v274_v12 = vld [vmem:[%s1570_s11 + $0x50] sm:$0xff]  ;;  %v434_v14 = vadd.f32 %v270_v7, %v266_v3  ;;  %v455_v15 = vadd.f32 %v271_v8, %v267_v4  ;;  %v275_v16 = vld [vmem:[%s1570_s11 + $0x58] sm:$0xff] }
  0x39   : > { %v276_v17 = vld [vmem:[%s1570_s11 + $0x60] sm:$0xff]  ;;  %v277_v18 = vld [vmem:[%s1570_s11 + $0x68] sm:$0xff]  ;;  %v393_v19 = vadd.f32 %v392_v9, %v272_v10  ;;  %v278_v20 = vld [vmem:[%s1570_s11 + $0x70] sm:$0xff]  ;;  %v414_v23 = vadd.f32 %v413_v13, %v273_v11 }
  0x3a   : > { %v279_v21 = vld [vmem:[%s1570_s11 + $0x78] sm:$0xff]  ;;  %v280_v22 = vld [vmem:[%s1570_s11 + $0x80] sm:$0xff]  ;;  %v435_v24 = vadd.f32 %v434_v14, %v274_v12  ;;  %v456_v25 = vadd.f32 %v455_v15, %v275_v16  ;;  %v281_v26 = vld [vmem:[%s1570_s11 + $0x88] sm:$0xff] }
  0x3b   : > { %v282_v27 = vld [vmem:[%s1570_s11 + $0x90] sm:$0xff]  ;;  %v283_v28 = vld [vmem:[%s1570_s11 + $0x98] sm:$0xff]  ;;  %v394_v29 = vadd.f32 %v393_v19, %v276_v17  ;;  %v284_v30 = vld [vmem:[%s1570_s11 + $0xa0] sm:$0xff]  ;;  %v415_v31 = vadd.f32 %v414_v23, %v277_v18 }
  0x3c   : > { %v436_v32 = vadd.f32 %v435_v24, %v278_v20  ;;  %v457_v33 = vadd.f32 %v456_v25, %v279_v21  ;;  %v285_v34 = vld [vmem:[%s1570_s11 + $0xa8] sm:$0xff]  ;;  %v286_v35 = vld [vmem:[%s1570_s11 + $0xb0] sm:$0xff]  ;;  %v287_v36 = vld [vmem:[%s1570_s11 + $0xb8] sm:$0xff] }
  0x3d   : > { %v395_v37 = vadd.f32 %v394_v29, %v280_v22  ;;  %v288_v38 = vld [vmem:[%s1570_s11 + $0xc0] sm:$0xff]  ;;  %v416_v39 = vadd.f32 %v415_v31, %v281_v26  ;;  %v289_v42 = vld [vmem:[%s1570_s11 + $0xc8] sm:$0xff]  ;;  %v290_v43 = vld [vmem:[%s1570_s11 + $0xd0] sm:$0xff] }
  0x3e   : > { %v437_v40 = vadd.f32 %v436_v32, %v282_v27  ;;  %v458_v41 = vadd.f32 %v457_v33, %v283_v28  ;;  %v291_v44 = vld [vmem:[%s1570_s11 + $0xd8] sm:$0xff]  ;;  %v292_v46 = vld [vmem:[%s1570_s11 + $0xe0] sm:$0xff]  ;;  %v293_v50 = vld [vmem:[%s1570_s11 + $0xe8] sm:$0xff] }
  0x3f   : > { %v396_v45 = vadd.f32 %v395_v37, %v284_v30  ;;  %v417_v47 = vadd.f32 %v416_v39, %v285_v34  ;;  %v294_v51 = vld [vmem:[%s1570_s11 + $0xf0] sm:$0xff]  ;;  %v295_v52 = vld [vmem:[%s1570_s11 + $0xf8] sm:$0xff]  ;;  %v296_v54 = vld [vmem:[%s1570_s11 + $0x100] sm:$0xff] }
  0x40   : > { %v438_v48 = vadd.f32 %v437_v40, %v286_v35  ;;  %v459_v49 = vadd.f32 %v458_v41, %v287_v36  ;;  %v297_v58 = vld [vmem:[%s1570_s11 + $0x108] sm:$0xff]  ;;  %v298_v59 = vld [vmem:[%s1570_s11 + $0x110] sm:$0xff]  ;;  %v299_v60 = vld [vmem:[%s1570_s11 + $0x118] sm:$0xff] }
  0x41   : > { %v397_v53 = vadd.f32 %v396_v45, %v288_v38  ;;  %v418_v55 = vadd.f32 %v417_v47, %v289_v42  ;;  %v300_v62 = vld [vmem:[%s1570_s11 + $0x120] sm:$0xff]  ;;  %v301_v2 = vld [vmem:[%s1570_s11 + $0x128] sm:$0xff]  ;;  %v302_v3 = vld [vmem:[%s1570_s11 + $0x130] sm:$0xff] }
  0x42   : > { %v439_v56 = vadd.f32 %v438_v48, %v290_v43  ;;  %v460_v57 = vadd.f32 %v459_v49, %v291_v44  ;;  %v303_v4 = vld [vmem:[%s1570_s11 + $0x138] sm:$0xff]  ;;  %v304_v6 = vld [vmem:[%s1570_s11 + $0x140] sm:$0xff]  ;;  %v305_v7 = vld [vmem:[%s1570_s11 + $0x148] sm:$0xff] }
  0x43   : > { %v398_v61 = vadd.f32 %v397_v53, %v292_v46  ;;  %v419_v63 = vadd.f32 %v418_v55, %v293_v50  ;;  %v306_v11 = vld [vmem:[%s1570_s11 + $0x150] sm:$0xff]  ;;  %v307_v12 = vld [vmem:[%s1570_s11 + $0x158] sm:$0xff]  ;;  %v308_v13 = vld [vmem:[%s1570_s11 + $0x160] sm:$0xff] }
  0x44   : > { %v440_v0 = vadd.f32 %v439_v56, %v294_v51  ;;  %v461_v1 = vadd.f32 %v460_v57, %v295_v52  ;;  %v309_v15 = vld [vmem:[%s1570_s11 + $0x168] sm:$0xff]  ;;  %v310_v16 = vld [vmem:[%s1570_s11 + $0x170] sm:$0xff]  ;;  %v311_v17 = vld [vmem:[%s1570_s11 + $0x178] sm:$0xff] }
  0x45   : > { %v399_v5 = vadd.f32 %v398_v61, %v296_v54  ;;  %v420_v8 = vadd.f32 %v419_v63, %v297_v58  ;;  %v312_v21 = vld [vmem:[%s1570_s11 + $0x180] sm:$0xff]  ;;  %v313_v22 = vld [vmem:[%s1570_s11 + $0x188] sm:$0xff]  ;;  %v314_v23 = vld [vmem:[%s1570_s11 + $0x190] sm:$0xff] }
  0x46   : > { %v441_v9 = vadd.f32 %v440_v0, %v298_v59  ;;  %v462_v10 = vadd.f32 %v461_v1, %v299_v60  ;;  %v315_v25 = vld [vmem:[%s1570_s11 + $0x198] sm:$0xff]  ;;  %v316_v26 = vld [vmem:[%s1570_s11 + $0x1a0] sm:$0xff]  ;;  %v317_v31 = vld [vmem:[%s1570_s11 + $0x1a8] sm:$0xff] }
  0x47   : > { %v400_v14 = vadd.f32 %v399_v5, %v300_v62  ;;  %v421_v18 = vadd.f32 %v420_v8, %v301_v2  ;;  %v328_v27 = vld [vmem:[%s1570_s11 + $0x200] sm:$0xff]  ;;  %v318_v32 = vld [vmem:[%s1570_s11 + $0x1b0] sm:$0xff]  ;;  %v319_v33 = vld [vmem:[%s1570_s11 + $0x1b8] sm:$0xff] }
  0x48   : > { %v442_v19 = vadd.f32 %v441_v9, %v302_v3  ;;  %v463_v20 = vadd.f32 %v462_v10, %v303_v4  ;;  %v329_v34 = vld [vmem:[%s1570_s11 + $0x208] sm:$0xff]  ;;  %v330_v35 = vld [vmem:[%s1570_s11 + $0x210] sm:$0xff]  ;;  %v331_v36 = vld [vmem:[%s1570_s11 + $0x218] sm:$0xff] }
  0x49   : > { %v401_v24 = vadd.f32 %v400_v14, %v304_v6  ;;  %v422_v28 = vadd.f32 %v421_v18, %v305_v7  ;;  %v332_v38 = vld [vmem:[%s1570_s11 + $0x220] sm:$0xff]  ;;  %v333_v39 = vld [vmem:[%s1570_s11 + $0x228] sm:$0xff]  ;;  %v334_v40 = vld [vmem:[%s1570_s11 + $0x230] sm:$0xff] }
  0x4a   : > { %v443_v29 = vadd.f32 %v442_v19, %v306_v11  ;;  %v464_v30 = vadd.f32 %v463_v20, %v307_v12  ;;  %v335_v44 = vld [vmem:[%s1570_s11 + $0x238] sm:$0xff]  ;;  %v336_v45 = vld [vmem:[%s1570_s11 + $0x240] sm:$0xff]  ;;  %v337_v46 = vld [vmem:[%s1570_s11 + $0x248] sm:$0xff]  ;;  %v476_v48 = vadd.f32 %v332_v38, %v328_v27  ;;  %v497_v49 = vadd.f32 %v333_v39, %v329_v34 }
  0x4b   : > { %v402_v37 = vadd.f32 %v401_v24, %v308_v13  ;;  %v423_v41 = vadd.f32 %v422_v28, %v309_v15  ;;  %v518_v50 = vadd.f32 %v334_v40, %v330_v35  ;;  %v320_v51 = vld [vmem:[%s1570_s11 + $0x1c0] sm:$0xff]  ;;  %v338_v52 = vld [vmem:[%s1570_s11 + $0x250] sm:$0xff]  ;;  %v339_v53 = vld [vmem:[%s1570_s11 + $0x258] sm:$0xff]  ;;  %v539_v58 = vadd.f32 %v335_v44, %v331_v36 }
  0x4c   : > { %v444_v42 = vadd.f32 %v443_v29, %v310_v16  ;;  %v465_v43 = vadd.f32 %v464_v30, %v311_v17  ;;  %v340_v54 = vld [vmem:[%s1570_s11 + $0x260] sm:$0xff]  ;;  %v321_v59 = vld [vmem:[%s1570_s11 + $0x1c8] sm:$0xff]  ;;  %v342_v61 = vld [vmem:[%s1570_s11 + $0x270] sm:$0xff]  ;;  %v477_v0 = vadd.f32 %v476_v48, %v336_v45  ;;  %v498_v1 = vadd.f32 %v497_v49, %v337_v46 }
  0x4d   : > { %v403_v47 = vadd.f32 %v402_v37, %v312_v21  ;;  %v424_v55 = vadd.f32 %v423_v41, %v313_v22  ;;  %v341_v60 = vld [vmem:[%s1570_s11 + $0x268] sm:$0xff]  ;;  %v343_v62 = vld [vmem:[%s1570_s11 + $0x278] sm:$0xff]  ;;  %v519_v2 = vadd.f32 %v518_v50, %v338_v52  ;;  %v344_v3 = vld [vmem:[%s1570_s11 + $0x280] sm:$0xff]  ;;  %v540_v9 = vadd.f32 %v539_v58, %v339_v53 }
  0x4e   : > { %v445_v56 = vadd.f32 %v444_v42, %v314_v23  ;;  %v466_v57 = vadd.f32 %v465_v43, %v315_v25  ;;  %v345_v4 = vld [vmem:[%s1570_s11 + $0x288] sm:$0xff]  ;;  %v346_v5 = vld [vmem:[%s1570_s11 + $0x290] sm:$0xff]  ;;  %v323_v11 = vld [vmem:[%s1570_s11 + $0x1d8] sm:$0xff]  ;;  %v478_v13 = vadd.f32 %v477_v0, %v340_v54  ;;  %v499_v14 = vadd.f32 %v498_v1, %v341_v60 }
  0x4f   : > { %v404_v63 = vadd.f32 %v403_v47, %v316_v26  ;;  %v425_v6 = vadd.f32 %v424_v55, %v317_v31  ;;  %v322_v10 = vld [vmem:[%s1570_s11 + $0x1d0] sm:$0xff]  ;;  %v347_v12 = vld [vmem:[%s1570_s11 + $0x298] sm:$0xff]  ;;  %v520_v15 = vadd.f32 %v519_v2, %v342_v61  ;;  %v348_v16 = vld [vmem:[%s1570_s11 + $0x2a0] sm:$0xff]  ;;  %v541_v19 = vadd.f32 %v540_v9, %v343_v62 }
  0x50   : > { %v446_v7 = vadd.f32 %v445_v56, %v318_v32  ;;  %v467_v8 = vadd.f32 %v466_v57, %v319_v33  ;;  %v349_v17 = vld [vmem:[%s1570_s11 + $0x2a8] sm:$0xff]  ;;  %v350_v18 = vld [vmem:[%s1570_s11 + $0x2b0] sm:$0xff]  ;;  %v324_v20 = vld [vmem:[%s1570_s11 + $0x1e0] sm:$0xff]  ;;  %v479_v24 = vadd.f32 %v478_v13, %v344_v3  ;;  %v500_v25 = vadd.f32 %v499_v14, %v345_v4 }
  0x51   : > { %v325_v21 = vld [vmem:[%s1570_s11 + $0x1e8] sm:$0xff]  ;;  %v351_v22 = vld [vmem:[%s1570_s11 + $0x2b8] sm:$0xff]  ;;  %v405_v23 = vadd.f32 %v404_v63, %v320_v51  ;;  %v521_v26 = vadd.f32 %v520_v15, %v346_v5  ;;  %v352_v27 = vld [vmem:[%s1570_s11 + $0x2c0] sm:$0xff]  ;;  %v426_v30 = vadd.f32 %v425_v6, %v321_v59  ;;  %v542_v33 = vadd.f32 %v541_v19, %v347_v12 }
  0x52   : > { %v353_v28 = vld [vmem:[%s1570_s11 + $0x2c8] sm:$0xff]  ;;  %v354_v29 = vld [vmem:[%s1570_s11 + $0x2d0] sm:$0xff]  ;;  %v447_v31 = vadd.f32 %v446_v7, %v322_v10  ;;  %v468_v32 = vadd.f32 %v467_v8, %v323_v11  ;;  %v327_v35 = vld [vmem:[%s1570_s11 + $0x1f8] sm:$0xff]  ;;  %v480_v37 = vadd.f32 %v479_v24, %v348_v16  ;;  %v501_v38 = vadd.f32 %v500_v25, %v349_v17 }
  0x53   : > { %v326_v34 = vld [vmem:[%s1570_s11 + $0x1f0] sm:$0xff]  ;;  %v355_v36 = vld [vmem:[%s1570_s11 + $0x2d8] sm:$0xff]  ;;  %v522_v39 = vadd.f32 %v521_v26, %v350_v18  ;;  %v356_v40 = vld [vmem:[%s1570_s11 + $0x2e0] sm:$0xff]  ;;  %v543_v43 = vadd.f32 %v542_v33, %v351_v22  ;;  %v406_v45 = vadd.f32 %v405_v23, %v324_v20  ;;  %v427_v52 = vadd.f32 %v426_v30, %v325_v21 }
  0x54   : > { %v357_v41 = vld [vmem:[%s1570_s11 + $0x2e8] sm:$0xff]  ;;  %v358_v42 = vld [vmem:[%s1570_s11 + $0x2f0] sm:$0xff]  ;;  %v359_v44 = vld [vmem:[%s1570_s11 + $0x2f8] sm:$0xff]  ;;  %v481_v46 = vadd.f32 %v480_v37, %v352_v27  ;;  %v502_v47 = vadd.f32 %v501_v38, %v353_v28  ;;  %v448_v53 = vadd.f32 %v447_v31, %v326_v34  ;;  %v469_v54 = vadd.f32 %v468_v32, %v327_v35 }
  0x55   : > { %v523_v48 = vadd.f32 %v522_v39, %v354_v29  ;;  %v360_v49 = vld [vmem:[%s1570_s11 + $0x300] sm:$0xff]  ;;  %v361_v50 = vld [vmem:[%s1570_s11 + $0x308] sm:$0xff]  ;;  %v362_v51 = vld [vmem:[%s1570_s11 + $0x310] sm:$0xff]  ;;  %v544_v55 = vadd.f32 %v543_v43, %v355_v36  ;;  %v407_v1 = vrot.slane %v406_v45, 4  ;;  %v428_v8 = vrot.slane %v427_v52, 4 }
  0x56   : > { %v363_v56 = vld [vmem:[%s1570_s11 + $0x318] sm:$0xff]  ;;  %v482_v57 = vadd.f32 %v481_v46, %v356_v40  ;;  %v503_v58 = vadd.f32 %v502_v47, %v357_v41  ;;  %v364_v60 = vld [vmem:[%s1570_s11 + $0x320] sm:$0xff]  ;;  %v365_v61 = vld [vmem:[%s1570_s11 + $0x328] sm:$0xff]  ;;  %v449_v9 = vrot.slane %v448_v53, 4  ;;  %v470_v10 = vrot.slane %v469_v54, 4 }
  0x57   : > { %v524_v59 = vadd.f32 %v523_v48, %v358_v42  ;;  %v366_v62 = vld [vmem:[%s1570_s11 + $0x330] sm:$0xff]  ;;  %v545_v63 = vadd.f32 %v544_v55, %v359_v44  ;;  %v367_v0 = vld [vmem:[%s1570_s11 + $0x338] sm:$0xff]  ;;  %v368_v5 = vld [vmem:[%s1570_s11 + $0x340] sm:$0xff]  ;;  %v408_v21 = vadd.f32 %v407_v1, %v406_v45  ;;  %v429_v28 = vadd.f32 %v428_v8, %v427_v52 }
  0x58   : > { %v483_v2 = vadd.f32 %v482_v57, %v360_v49  ;;  %v504_v3 = vadd.f32 %v503_v58, %v361_v50  ;;  %v369_v6 = vld [vmem:[%s1570_s11 + $0x348] sm:$0xff]  ;;  %v370_v7 = vld [vmem:[%s1570_s11 + $0x350] sm:$0xff]  ;;  %v371_v12 = vld [vmem:[%s1570_s11 + $0x358] sm:$0xff]  ;;  %v450_v29 = vadd.f32 %v449_v9, %v448_v53  ;;  %v471_v30 = vadd.f32 %v470_v10, %v469_v54 }
  0x59   : > { %v525_v4 = vadd.f32 %v524_v59, %v362_v51  ;;  %v546_v11 = vadd.f32 %v545_v63, %v363_v56  ;;  %v372_v16 = vld [vmem:[%s1570_s11 + $0x360] sm:$0xff]  ;;  %v373_v17 = vld [vmem:[%s1570_s11 + $0x368] sm:$0xff]  ;;  %v374_v18 = vld [vmem:[%s1570_s11 + $0x370] sm:$0xff]  ;;  %v409_v41 = vrot.slane %v408_v21, 2  ;;  %v430_v48 = vrot.slane %v429_v28, 2 }
  0x5a   : > { %v484_v13 = vadd.f32 %v483_v2, %v364_v60  ;;  %v505_v14 = vadd.f32 %v504_v3, %v365_v61  ;;  %v375_v20 = vld [vmem:[%s1570_s11 + $0x378] sm:$0xff]  ;;  %v376_v25 = vld [vmem:[%s1570_s11 + $0x380] sm:$0xff]  ;;  %v377_v26 = vld [vmem:[%s1570_s11 + $0x388] sm:$0xff]  ;;  %v451_v49 = vrot.slane %v450_v29, 2  ;;  %v472_v50 = vrot.slane %v471_v30, 2 }
  0x5b   : > { %v526_v15 = vadd.f32 %v525_v4, %v366_v62  ;;  %v547_v19 = vadd.f32 %v546_v11, %v367_v0  ;;  %v378_v27 = vld [vmem:[%s1570_s11 + $0x390] sm:$0xff]  ;;  %v379_v32 = vld [vmem:[%s1570_s11 + $0x398] sm:$0xff]  ;;  %v380_v36 = vld [vmem:[%s1570_s11 + $0x3a0] sm:$0xff]  ;;  %v410_v61 = vadd.f32 %v409_v41, %v408_v21  ;;  %v431_v1 = vadd.f32 %v430_v48, %v429_v28 }
  0x5c   : > { %v485_v22 = vadd.f32 %v484_v13, %v368_v5  ;;  %v506_v23 = vadd.f32 %v505_v14, %v369_v6  ;;  %v381_v37 = vld [vmem:[%s1570_s11 + $0x3a8] sm:$0xff]  ;;  %v382_v38 = vld [vmem:[%s1570_s11 + $0x3b0] sm:$0xff]  ;;  %v383_v40 = vld [vmem:[%s1570_s11 + $0x3b8] sm:$0xff]  ;;  %v452_v2 = vadd.f32 %v451_v49, %v450_v29  ;;  %v473_v3 = vadd.f32 %v472_v50, %v471_v30 }
  0x5d   : > { %v527_v24 = vadd.f32 %v526_v15, %v370_v7  ;;  %v548_v31 = vadd.f32 %v547_v19, %v371_v12  ;;  %v384_v45 = vld [vmem:[%s1570_s11 + $0x3c0] sm:$0xff]  ;;  %v385_v46 = vld [vmem:[%s1570_s11 + $0x3c8] sm:$0xff]  ;;  %v386_v47 = vld [vmem:[%s1570_s11 + $0x3d0] sm:$0xff]  ;;  %v573_v9 = vlaneseq  ;;  %v411_v10 = vrot.slane %v410_v61, 1 }
  0x5e   : > { %v486_v33 = vadd.f32 %v485_v22, %v372_v16  ;;  %v507_v34 = vadd.f32 %v506_v23, %v373_v17  ;;  %v387_v52 = vld [vmem:[%s1570_s11 + $0x3d8] sm:$0xff]  ;;  %v388_v56 = vld [vmem:[%s1570_s11 + $0x3e0] sm:$0xff]  ;;  %v389_v57 = vld [vmem:[%s1570_s11 + $0x3e8] sm:$0xff]  ;;  %v432_v14 = vrot.slane %v431_v1, 1  ;;  %v453_v15 = vrot.slane %v452_v2, 1 }
  0x5f   : > { %v528_v35 = vadd.f32 %v527_v24, %v374_v18  ;;  %v549_v39 = vadd.f32 %v548_v31, %v375_v20  ;;  %v390_v58 = vld [vmem:[%s1570_s11 + $0x3f0] sm:$0xff]  ;;  %v391_v60 = vld [vmem:[%s1570_s11 + $0x3f8] sm:$0xff]  ;;  %v474_v16 = vrot.slane %v473_v3, 1  ;;  %v1469_v21 = vmov 1983009808  }
  0x60   : > { %v487_v42 = vadd.f32 %v486_v33, %v376_v25  ;;  %v508_v43 = vadd.f32 %v507_v34, %v377_v26  ;;  %v571_v22 = vunpack.c.l.s4 %v1469_v21  ;;  %v1705_v24 = vshrl.u32 %v573_v9, 7  ;;  %v656_v9 = vld [vmem:[%s2012_s1 + $0x100] sm:$0xff] (!%p1159_p12) }
  0x61   : > { %v529_v44 = vadd.f32 %v528_v35, %v378_v27  ;;  %v550_v51 = vadd.f32 %v549_v39, %v379_v32  ;;  %v412_v25 = vadd.f32 %v411_v10, %v410_v61  ;;  %v433_v29 = vadd.f32 %v432_v14, %v431_v1  ;;  %v641_v1 = vld [vmem:[%s2012_s1 + $0x88] sm:$0xff] (!%p1159_p12)  ;;  %v626_v14 = vld [vmem:[%s2012_s1 + $0x10] sm:$0xff] (!%p1159_p12) }
  0x62   : > { %v488_v53 = vadd.f32 %v487_v42, %v380_v36  ;;  %v509_v54 = vadd.f32 %v508_v43, %v381_v37  ;;  %v454_v30 = vadd.f32 %v453_v15, %v452_v2  ;;  %v475_v31 = vadd.f32 %v474_v16, %v473_v3  ;;  %v624_v2 = vld [vmem:[%s2012_s1] sm:$0xff] (!%p1159_p12)  ;;  %v657_v10 = vld [vmem:[%s2012_s1 + $0x108] sm:$0xff] (!%p1159_p12)  ;;  %v627_v15 = vld [vmem:[%s2012_s1 + $0x18] sm:$0xff] (!%p1159_p12) }
  0x63   : > { %v530_v55 = vadd.f32 %v529_v44, %v382_v38  ;;  %v551_v59 = vadd.f32 %v550_v51, %v383_v40  ;;  %v572_v36 = vunpack.c.0.s8 %v571_v22  ;;  %v568_v42 = vcombine.low %v412_v25, %v433_v29  ;;  %v659_v22 = vld [vmem:[%s2012_s1 + $0x118] sm:$0xff] (!%p1159_p12)  ;;  %v645_v25 = vld [vmem:[%s2012_s1 + $0xa8] sm:$0xff] (!%p1159_p12) }
  0x64   : > { %v489_v62 = vadd.f32 %v488_v53, %v384_v45  ;;  %v510_v63 = vadd.f32 %v509_v54, %v385_v46  ;;  %v569_v43 = vcombine.low %v454_v30, %v475_v31  ;;  %v629_v29 = vld [vmem:[%s2012_s1 + $0x28] sm:$0xff] (!%p1159_p12)  ;;  %v676_v30 = vld [vmem:[%s2012_s1 + $0x1a0] sm:$0xff] (!%p1159_p12) }
  0x65   : > { %v531_v0 = vadd.f32 %v530_v55, %v386_v47  ;;  %v552_v4 = vadd.f32 %v551_v59, %v387_v52  ;;  %v1708_v47 = vsub.s32 %v572_v36, %v1705_v24  ;;  %v263_v59 = vld [vmem:[#allocation2] sm:$0xff]  ;;  %v677_v31 = vld [vmem:[%s2012_s1 + $0x1a8] sm:$0xff] (!%p1159_p12)  ;;  %v646_v36 = vld [vmem:[%s2012_s1 + $0xb0] sm:$0xff] (!%p1159_p12) }
  0x66   : > { %v490_v5 = vadd.f32 %v489_v62, %v388_v56  ;;  %v511_v6 = vadd.f32 %v510_v63, %v389_v57 }
  0x67   : > { %v532_v7 = vadd.f32 %v531_v0, %v390_v58  ;;  %v553_v8 = vadd.f32 %v552_v4, %v391_v60  ;;  %v576_v50 = vrot.slane %v568_v42, %v1708_v47  ;;  %v583_v51 = vrot.slane %v569_v43, %v1708_v47  ;;  %v640_v0 = vld [vmem:[%s2012_s1 + $0x80] sm:$0xff] (!%p1159_p12)  ;;  %v625_v4 = vld [vmem:[%s2012_s1 + $0x8] sm:$0xff] (!%p1159_p12)  ;;  %v678_v42 = vld [vmem:[%s2012_s1 + $0x1b0] sm:$0xff] (!%p1159_p12) }
  0x68   : > { %v491_v11 = vrot.slane %v490_v5, 4  ;;  %v512_v12 = vrot.slane %v511_v6, 4  ;;  %v1243_v3 = vpack.c.bf16 (!%p1159_p12), %v641_v1, %v640_v0  ;;  %v679_v43 = vld [vmem:[%s2012_s1 + $0x1b8] sm:$0xff] (!%p1159_p12) }
  0x69   : > { %v533_v13 = vrot.slane %v532_v7, 4  ;;  %v554_v17 = vrot.slane %v553_v8, 4  ;;  %v584_v55 = vcombine.low %v576_v50, %v583_v51  ;;  %v680_v51 = vld [vmem:[%s2012_s1 + $0x1c0] sm:$0xff] (!%p1159_p12) }
  0x6a   : > { %v492_v18 = vadd.f32 %v491_v11, %v490_v5  ;;  %v513_v19 = vadd.f32 %v512_v12, %v511_v6  ;;  %v672_v5 = vld [vmem:[%s2012_s1 + $0x180] sm:$0xff] (!%p1159_p12)  ;;  %v673_v6 = vld [vmem:[%s2012_s1 + $0x188] sm:$0xff] (!%p1159_p12)  ;;  %v642_v11 = vld [vmem:[%s2012_s1 + $0x90] sm:$0xff] (!%p1159_p12)  ;;  %1244 = vmatprep.subr.bf16.mxu0 (!%p1159_p12), %v1243_v3  ;;  %v1277_v12 = vpack.c.bf16 (!%p1159_p12), %v657_v10, %v656_v9 }
  0x6b   : > { %v534_v20 = vadd.f32 %v533_v13, %v532_v7  ;;  %v555_v23 = vadd.f32 %v554_v17, %v553_v8  ;;  %v1245_v7 = vpack.c.bf16 (!%p1159_p12), %v625_v4, %v624_v2  ;;  %v1275_v8 = vpack.c.bf16 (!%p1159_p12), %v673_v6, %v672_v5  ;;  %v643_v13 = vld [vmem:[%s2012_s1 + $0x98] sm:$0xff] (!%p1159_p12)  ;;  %v634_v3 = vld [vmem:[%s2012_s1 + $0x50] sm:$0xff] (!%p1159_p12)  ;;  %v653_v9 = vld [vmem:[%s2012_s1 + $0xe8] sm:$0xff] (!%p1159_p12) }
  0x6c   : > { %v493_v26 = vrot.slane %v492_v18, 2  ;;  %v514_v27 = vrot.slane %v513_v19, 2  ;;  %v1247_v16 = vpack.c.bf16 (!%p1159_p12), %v643_v13, %v642_v11  ;;  %v1249_v17 = vpack.c.bf16 (!%p1159_p12), %v627_v15, %v626_v14  ;;  %v635_v4 = vld [vmem:[%s2012_s1 + $0x58] sm:$0xff] (!%p1159_p12)  ;;  %v666_v5 = vld [vmem:[%s2012_s1 + $0x150] sm:$0xff] (!%p1159_p12)  ;;  %v684_v10 = vld [vmem:[%s2012_s1 + $0x1e0] sm:$0xff] (!%p1159_p12) }
  0x6d   : > { %v535_v28 = vrot.slane %v534_v20, 2  ;;  %v556_v32 = vrot.slane %v555_v23, 2  ;;  %1246 = vmatpush3.bf16.msra.mxu0 (!%p1159_p12), %v1245_v7  ;;  %1276 = vmatprep.subr.bf16.mxu1 (!%p1159_p12), %v1275_v8  ;;  %v667_v7 = vld [vmem:[%s2012_s1 + $0x158] sm:$0xff] (!%p1159_p12)  ;;  %v652_v8 = vld [vmem:[%s2012_s1 + $0xe0] sm:$0xff] (!%p1159_p12)  ;;  %v685_v11 = vld [vmem:[%s2012_s1 + $0x1e8] sm:$0xff] (!%p1159_p12) }
  0x6e   : > { %v494_v33 = vadd.f32 %v493_v26, %v492_v18  ;;  %v515_v34 = vadd.f32 %v514_v27, %v513_v19  ;;  %v674_v18 = vld [vmem:[%s2012_s1 + $0x190] sm:$0xff] (!%p1159_p12)  ;;  %v675_v19 = vld [vmem:[%s2012_s1 + $0x198] sm:$0xff] (!%p1159_p12)  ;;  %1278 = vmatpush3.bf16.msra.mxu1 (!%p1159_p12), %v1277_v12  ;;  %1248 = vmatprep.subr.bf16.mxu0 (!%p1159_p12), %v1247_v16  ;;  %v1265_v12 = vpack.c.bf16 (!%p1159_p12), %v635_v4, %v634_v3  ;;  %v636_v13 = vld [vmem:[%s2012_s1 + $0x60] sm:$0xff] (!%p1159_p12)  ;;  %v1470_v3 = vmov (!%p1159_p12), 0.0  }
  0x6f   : > { %v536_v35 = vadd.f32 %v535_v28, %v534_v20  ;;  %v557_v37 = vadd.f32 %v556_v32, %v555_v23  ;;  %v658_v20 = vld [vmem:[%s2012_s1 + $0x110] sm:$0xff] (!%p1159_p12)  ;;  %v1279_v21 = vpack.c.bf16 (!%p1159_p12), %v675_v19, %v674_v18  ;;  %v644_v23 = vld [vmem:[%s2012_s1 + $0xa0] sm:$0xff] (!%p1159_p12)  ;;  %v1297_v14 = vpack.c.bf16 (!%p1159_p12), %v667_v7, %v666_v5  ;;  %v637_v16 = vld [vmem:[%s2012_s1 + $0x68] sm:$0xff] (!%p1159_p12) }
  0x70   : > { %v495_v38 = vrot.slane %v494_v33, 1  ;;  %v516_v39 = vrot.slane %v515_v34, 1  ;;  %v1281_v26 = vpack.c.bf16 (!%p1159_p12), %v659_v22, %v658_v20  ;;  %v1251_v27 = vpack.c.bf16 (!%p1159_p12), %v645_v25, %v644_v23  ;;  %v628_v28 = vld [vmem:[%s2012_s1 + $0x20] sm:$0xff] (!%p1159_p12)  ;;  %v669_v20 = vld [vmem:[%s2012_s1 + $0x168] sm:$0xff] (!%p1159_p12)  ;;  %v655_v22 = vld [vmem:[%s2012_s1 + $0xf8] sm:$0xff] (!%p1159_p12) }
  0x71   : > { %v537_v40 = vrot.slane %v536_v35, 1  ;;  %v558_v41 = vrot.slane %v557_v37, 1  ;;  %1280 = vmatprep.subr.bf16.mxu1 (!%p1159_p12), %v1279_v21  ;;  %v660_v32 = vld [vmem:[%s2012_s1 + $0x120] sm:$0xff] (!%p1159_p12)  ;;  %1250 = vmatpush3.bf16.msra.mxu0 (!%p1159_p12), %v1249_v17  ;;  %v1267_v15 = vpack.c.bf16 (!%p1159_p12), %v653_v9, %v652_v8  ;;  %v1299_v19 = vpack.c.bf16 (!%p1159_p12), %v685_v11, %v684_v10  ;;  %v654_v21 = vld [vmem:[%s2012_s1 + $0xf0] sm:$0xff] (!%p1159_p12) }
  0x72   : > { %v496_v44 = vadd.f32 %v495_v38, %v494_v33  ;;  %v517_v45 = vadd.f32 %v516_v39, %v515_v34  ;;  %v661_v33 = vld [vmem:[%s2012_s1 + $0x128] sm:$0xff] (!%p1159_p12)  ;;  %v1253_v34 = vpack.c.bf16 (!%p1159_p12), %v629_v29, %v628_v28  ;;  %v630_v38 = vld [vmem:[%s2012_s1 + $0x30] sm:$0xff] (!%p1159_p12)  ;;  %1282 = vmatpush3.bf16.msra.mxu1 (!%p1159_p12), %v1281_v26  ;;  %1252 = vmatprep.subr.bf16.mxu0 (!%p1159_p12), %v1251_v27  ;;  %v668_v17 = vld [vmem:[%s2012_s1 + $0x160] sm:$0xff] (!%p1159_p12) }
  0x73   : > { %v538_v46 = vadd.f32 %v537_v40, %v536_v35  ;;  %v559_v48 = vadd.f32 %v558_v41, %v557_v37  ;;  %v1283_v35 = vpack.c.bf16 (!%p1159_p12), %v677_v31, %v676_v30  ;;  %v647_v37 = vld [vmem:[%s2012_s1 + $0xb8] sm:$0xff] (!%p1159_p12)  ;;  %v1285_v39 = vpack.c.bf16 (!%p1159_p12), %v661_v33, %v660_v32  ;;  %v686_v25 = vld [vmem:[%s2012_s1 + $0x1f0] sm:$0xff] (!%p1159_p12)  ;;  %v1160_v5 = vld [vmem:[%s2013_s2] ss:$0 sm:$0xff] (!%p1159_p12) }
  0x74   : > { %v585_v49 = vcombine.low %v496_v44, %v517_v45  ;;  %v1255_v40 = vpack.c.bf16 (!%p1159_p12), %v647_v37, %v646_v36  ;;  %v631_v41 = vld [vmem:[%s2012_s1 + $0x38] sm:$0xff] (!%p1159_p12)  ;;  %v1287_v44 = vpack.c.bf16 (!%p1159_p12), %v679_v43, %v678_v42  ;;  %v662_v45 = vld [vmem:[%s2012_s1 + $0x130] sm:$0xff] (!%p1159_p12)  ;;  %v1269_v27 = vpack.c.bf16 (!%p1159_p12), %v637_v16, %v636_v13  ;;  %v859_v42 = vld [vmem:[%s2014_s3 + $0x8] sm:$0xff] (!%p1159_p12) }
  0x75   : > { %v586_v52 = vcombine.low %v538_v46, %v559_v48  ;;  %1284 = vmatprep.subr.bf16.mxu1 (!%p1159_p12), %v1283_v35  ;;  %v663_v46 = vld [vmem:[%s2012_s1 + $0x138] sm:$0xff] (!%p1159_p12)  ;;  %v648_v48 = vld [vmem:[%s2012_s1 + $0xc0] sm:$0xff] (!%p1159_p12)  ;;  %1254 = vmatpush3.bf16.msra.mxu0 (!%p1159_p12), %v1253_v34  ;;  %v1257_v50 = vpack.c.bf16 (!%p1159_p12), %v631_v41, %v630_v38  ;;  %v1301_v30 = vpack.c.bf16 (!%p1159_p12), %v669_v20, %v668_v17  ;;  %v638_v32 = vld [vmem:[%s2012_s1 + $0x70] sm:$0xff] (!%p1159_p12)  ;;  %v882_v17 = vsub.s32 (!%p1159_p12), 1, %v1705_v24 }
  0x76   : > { %v593_v53 = vrot.slane %v585_v49, %v1708_v47  ;;  %v649_v49 = vld [vmem:[%s2012_s1 + $0xc8] sm:$0xff] (!%p1159_p12)  ;;  %1286 = vmatpush3.bf16.msra.mxu1 (!%p1159_p12), %v1285_v39  ;;  %1256 = vmatprep.subr.bf16.mxu0 (!%p1159_p12), %v1255_v40  ;;  %v687_v26 = vld [vmem:[%s2012_s1 + $0x1f8] sm:$0xff] (!%p1159_p12)  ;;  %v1271_v31 = vpack.c.bf16 (!%p1159_p12), %v655_v22, %v654_v21  ;;  %v670_v35 = vld [vmem:[%s2012_s1 + $0x170] sm:$0xff] (!%p1159_p12) }
  0x77   : > { %v600_v54 = vrot.slane %v586_v52, %v1708_v47  ;;  %v681_v52 = vld [vmem:[%s2012_s1 + $0x1c8] sm:$0xff] (!%p1159_p12)  ;;  %1288 = vmatprep.subr.bf16.mxu1 (!%p1159_p12), %v1287_v44  ;;  %v639_v33 = vld [vmem:[%s2012_s1 + $0x78] sm:$0xff] (!%p1159_p12)  ;;  %v1303_v34 = vpack.c.bf16 (!%p1159_p12), %v687_v26, %v686_v25  ;;  %v874_v16 = vld [vmem:[%s2015_s4] sm:$0xf] (!%p1159_p12) }
  0x78   : > { %v671_v36 = vld [vmem:[%s2012_s1 + $0x178] sm:$0xff] (!%p1159_p12)  ;;  %v1273_v39 = vpack.c.bf16 (!%p1159_p12), %v639_v33, %v638_v32  ;;  %v863_v43 = vld [vmem:[%s2014_s3 + $0x28] sm:$0xff] (!%p1159_p12)  ;;  %v883_v21 = vrot.slane (!%p1159_p12), %v874_v16, %v882_v17 }
  0x79   : > { %v601_v56 = vcombine.low %v593_v53, %v600_v54  ;;  %v1289_v53 = vpack.c.bf16 (!%p1159_p12), %v663_v46, %v662_v45  ;;  %v1259_v54 = vpack.c.bf16 (!%p1159_p12), %v649_v49, %v648_v48  ;;  %1258 = vmatpush3.bf16.msra.mxu0 (!%p1159_p12), %v1257_v50  ;;  %v1305_v41 = vpack.c.bf16 (!%p1159_p12), %v671_v36, %v670_v35  ;;  %v861_v44 = vld [vmem:[%s2014_s3 + $0x18] sm:$0xff] (!%p1159_p12)  ;;  %v858_v48 = vld [vmem:[%s2014_s3] sm:$0xff] (!%p1159_p12) }
  0x7a   : > { %v1307_v45 = vpack.c.bf16 (!%p1159_p12), %v863_v43, %v859_v42  ;;  %v865_v46 = vld [vmem:[%s2014_s3 + $0x38] sm:$0xff] (!%p1159_p12)  ;;  %v862_v50 = vld [vmem:[%s2014_s3 + $0x20] sm:$0xff] (!%p1159_p12) }
  0x7b   : > { %v606_v57 = vrot.slane %v601_v56, 7  ;;  %v633_v56 = vld [vmem:[%s2012_s1 + $0x48] sm:$0xff] (!%p1159_p12)  ;;  %1290 = vmatpush3.bf16.msra.mxu1 (!%p1159_p12), %v1289_v53  ;;  %1260 = vmatprep.subr.bf16.mxu0 (!%p1159_p12), %v1259_v54  ;;  %v1315_v49 = vpack.c.bf16 (!%p1159_p12), %v865_v46, %v861_v44  ;;  %v1309_v53 = vpack.c.bf16 (!%p1159_p12), %v862_v50, %v858_v48 }
  0x7d   : > { %v608_v58 = vsel %vm607_vm0, %v606_v57, %v584_v55  ;;  %621 = sbr.rel (%p1159_p12) target bundleno = 619 (0x26b), region = 52  ;;  %v632_v55 = vld [vmem:[%s2012_s1 + $0x40] sm:$0xff] (!%p1159_p12) }
  0x7e   : > { %v610_v60 = vsel %vm609_vm1, %v606_v57, %v608_v58  ;;  %v1291_v58 = vpack.c.bf16 (!%p1159_p12), %v681_v52, %v680_v51  ;;  %v1261_v0 = vpack.c.bf16 (!%p1159_p12), %v633_v56, %v632_v55  ;;  %v860_v51 = vld [vmem:[%s2014_s3 + $0x10] sm:$0xff] (!%p1159_p12)  ;;  %v867_v55 = vld [vmem:[%s2014_s3 + $0x48] sm:$0xff] (!%p1159_p12) }
  0x7f   : > { %v612_v61 = vsel %vm611_vm2, %v606_v57, %v610_v60  ;;  %v650_v60 = vld [vmem:[%s2012_s1 + $0xd0] sm:$0xff] (!%p1159_p12)  ;;  %v871_v56 = vld [vmem:[%s2014_s3 + $0x68] sm:$0xff] (!%p1159_p12) }
  0x80   : > { %v614_v62 = vsel %vm613_vm3, %v606_v57, %v612_v61  ;;  %v664_v57 = vld [vmem:[%s2012_s1 + $0x140] sm:$0xff] (!%p1159_p12)  ;;  %v651_v61 = vld [vmem:[%s2012_s1 + $0xd8] sm:$0xff] (!%p1159_p12)  ;;  %1292 = vmatprep.subr.bf16.mxu1 (!%p1159_p12), %v1291_v58  ;;  %1262 = vmatpush3.bf16.msra.mxu0 (!%p1159_p12), %v1261_v0  ;;  %v864_v52 = vld [vmem:[%s2014_s3 + $0x30] sm:$0xff] (!%p1159_p12)  ;;  %v1311_v58 = vpack.c.bf16 (!%p1159_p12), %v871_v56, %v867_v55 }
  0x81   : > { %v616_v63 = vadd.f32 %v614_v62, %v263_v59  ;;  %v665_v59 = vld [vmem:[%s2012_s1 + $0x148] sm:$0xff] (!%p1159_p12)  ;;  %v682_v62 = vld [vmem:[%s2012_s1 + $0x1d0] sm:$0xff] (!%p1159_p12)  ;;  %v1263_v2 = vpack.c.bf16 (!%p1159_p12), %v651_v61, %v650_v60  ;;  %v1317_v54 = vpack.c.bf16 (!%p1159_p12), %v864_v52, %v860_v51  ;;  %v866_v60 = vld [vmem:[%s2014_s3 + $0x40] sm:$0xff] (!%p1159_p12) }
  0x82   : > { %v1293_v1 = vpack.c.bf16 (!%p1159_p12), %v665_v59, %v664_v57  ;;  %v869_v57 = vld [vmem:[%s2014_s3 + $0x58] sm:$0xff] (!%p1159_p12)  ;;  %v870_v61 = vld [vmem:[%s2014_s3 + $0x60] sm:$0xff] (!%p1159_p12)  ;;  %v868_v0 = vld [vmem:[%s2014_s3 + $0x50] sm:$0xff] (!%p1159_p12) }
  0x83   : > { %617 = vst [vmem:[#allocation2] sm:$0xff] %v616_v63  ;;  %v683_v63 = vld [vmem:[%s2012_s1 + $0x1d8] sm:$0xff] (!%p1159_p12)  ;;  %1264 = vmatprep.subr.bf16.mxu0 (!%p1159_p12), %v1263_v2 }
  0x84   : > { %v1295_v6 = vpack.c.bf16 %v683_v63, %v682_v62  ;;  %1294 = vmatpush3.bf16.msra.mxu1 %v1293_v1  ;;  %1266 = vmatpush3.bf16.msra.mxu0 %v1265_v12  ;;  %v873_v59 = vld [vmem:[%s2014_s3 + $0x78] sm:$0xff]  ;;  %v1313_v63 = vpack.c.bf16 %v870_v61, %v866_v60  ;;  %v872_v1 = vld [vmem:[%s2014_s3 + $0x70] sm:$0xff] }
  0x85   : > { %1268 = vmatprep.subr.bf16.mxu0 %v1267_v15  ;;  %v1319_v62 = vpack.c.bf16 %v873_v59, %v869_v57  ;;  %v1321_v2 = vpack.c.bf16 %v872_v1, %v868_v0  ;;  %v886_v15 = vsub.s32 2, %v1705_v24 }
  0x86   : > { %1296 = vmatprep.subr.bf16.mxu1 %v1295_v6 }
  0x87   : > { %v887_v20 = vrot.slane %v874_v16, %v886_v15 }
  0x88   : > { %1298 = vmatpush3.bf16.msra.mxu1 %v1297_v14  ;;  %1270 = vmatpush3.bf16.msra.mxu0 %v1269_v27  ;;  %v878_v14 = vsub.s32 0, %v1705_v24 }
  0x89   : > { %1300 = vmatprep.subr.bf16.mxu1 %v1299_v19  ;;  %1272 = vmatprep.subr.bf16.mxu0 %v1271_v31 }
  0x8a   : > { %v622_v18 = vld [vmem:[#allocation2] sm:$0xff]  ;;  %v879_v19 = vrot.slane %v874_v16, %v878_v14 }
  0x8b   : > { %v1889_v23 = vmul.f32 0.00390625, %v622_v18  ;;  %v890_v18 = vsub.s32 3, %v1705_v24 }
  0x8c   : > { %1302 = vmatpush3.bf16.msra.mxu1 %v1301_v30  ;;  %1274 = vmatpush3.bf16.msra.mxu0 %v1273_v39 }
  0x8d   : > { %v703_v28 = vrot.slane %v1889_v23, %v1708_v47  ;;  %v696_v29 = vcombine.high %v1889_v23, %v1889_v23  ;;  %1304 = vmatprep.subr.bf16.mxu1 %v1303_v34  ;;  %1308 = vmatprep.subr.bf16.mxu0 %v1307_v45  ;;  %v891_v22 = vrot.slane %v874_v16, %v890_v18 }
  0x8f   : > { %v711_v37 = vcombine.high %v703_v28, %v703_v28  ;;  %v710_v38 = vrot.slane %v696_v29, %v1708_v47 }
  0x90   : > { %1306 = vmatpush3.bf16.msra.mxu1 %v1305_v41 }
  0x91   : > { %781 = vmatprep.mubr.f32.mxu0 %v711_v37  ;;  %v712_v40 = vcombine.high %v710_v38, %v710_v38  ;;  %1316 = vmatprep.subr.bf16.mxu1 %v1315_v49 }
  0x92   : > { %782 = vmatmul.mubr.f32.vlgmr.msra.gmra.mrb[0].mxu0 %v703_v28 }
  0x93   : > { %851 = vmatprep.mubr.f32.mxu1 %v712_v40  ;;  %1310 = vmatpush1.bf16.msra.mxu0 %v1309_v53 }
  0x94   : > { %852 = vmatmul.mubr.f32.vlgmr.msra.gmra.mrb[0].mxu1 %v710_v38  ;;  %1312 = vmatprep.subr.bf16.mxu0 %v1311_v58 }
  0x95   : > { %1318 = vmatpush1.bf16.msra.mxu1 %v1317_v54  ;;  %964 = vmatprep.mubr.f32.mxu0 %v1470_v3 }
  0x96   : > { %1320 = vmatprep.subr.bf16.mxu1 %v1319_v62  ;;  %1035 = vmatprep.mubr.f32.mxu1 %v1470_v3 }
  0x97   : > { %1314 = vmatpush1.bf16.msra.mxu0 %v1313_v63 }
  0x99   : > { %1322 = vmatpush1.bf16.msra.mxu1 %v1321_v2 }
 0x165   : > { %v1205_v4 = vpop.f32.mrb[0].mxu0 }
 0x166   : > { %v1206_v6 = vpop.f32.mrb[1].mxu0 }
 0x167   : > { %v1240_v7 = vpop.f32.mrb[0].mxu1  ;;  %v1207_v8 = vadd.f32 %v1206_v6, %v1205_v4 }
 0x168   : > { %v1241_v9 = vpop.f32.mrb[1].mxu1 }
 0x169   : > { %v1242_v10 = vadd.f32 %v1241_v9, %v1240_v7  ;;  %v784_v11 = vadd.f32 %v1207_v8, %v1160_v5 }
 0x16b   : > { %v854_v12 = vadd.f32 %v1242_v10, %v784_v11 }
 0x16d   : > { %v857_v13 = vmax.f32 %v854_v12, 0.0 }
 0x16f   : > { %1161 = vmatmul.mubr.msk.f32.vlgmr.msra.gmra.mrb[2].mxu0 %vm896_vm4, %v857_v13  ;;  %1162 = vmatmul.mubr.msk.f32.vlgmr.msra.gmra.mrb[2].mxu1 %vm896_vm4, %v857_v13 }
 0x242   : > { %v966_v25 = vpop.f32.mrb[2].mxu0  ;;  %v1037_v26 = vpop.f32.mrb[2].mxu1 }
 0x243   : > { %v967_v27 = vadd.f32 %v966_v25, %v879_v19  ;;  %v1038_v28 = vadd.f32 %v1037_v26, %v887_v20  ;;  %v968_v29 = vpop.f32.mrb[3].mxu0  ;;  %v1039_v30 = vpop.f32.mrb[3].mxu1 }
 0x244   : > { %v969_v31 = vadd.f32 %v968_v29, %v883_v21  ;;  %v1040_v32 = vadd.f32 %v1039_v30, %v891_v22 }
 0x245   : > { %v1163_v33 = vmul.f32 -1.442695, %v967_v27  ;;  %v1165_v34 = vmul.f32 -1.442695, %v1038_v28 }
 0x246   : > { %v1164_v35 = vmul.f32 -1.442695, %v969_v31  ;;  %v1166_v36 = vmul.f32 -1.442695, %v1040_v32 }
 0x247   : > { %1380 = vpow2.f32 %v1163_v33 }
 0x248   : > { %1382 = vpow2.f32 %v1165_v34 }
 0x249   : > { %1384 = vpow2.f32 %v1164_v35 }
 0x24a   : > { %1386 = vpow2.f32 %v1166_v36 }
 0x251   : > { %v1381_v24 = vpop.eup %1380 }
 0x252   : > { %v1383_v37 = vpop.eup %1382  ;;  %v1054_v38 = vadd.f32 1.0, %v1381_v24 }
 0x253   : > { %v1385_v39 = vpop.eup %1384  ;;  %v1056_v40 = vadd.f32 1.0, %v1383_v37 }
 0x254   : > { %v1387_v41 = vpop.eup %1386  ;;  %1388 = vrcp.f32 %v1054_v38  ;;  %v1055_v42 = vadd.f32 1.0, %v1385_v39 }
 0x255   : > { %1390 = vrcp.f32 %v1056_v40  ;;  %v1057_v43 = vadd.f32 1.0, %v1387_v41 }
 0x256   : > { %1392 = vrcp.f32 %v1055_v42 }
 0x257   : > { %1394 = vrcp.f32 %v1057_v43 }
 0x25e   : > { %v1389_v44 = vpop.eup %1388 }
 0x25f   : > { %v1391_v45 = vpop.eup %1390 }
 0x260   : > { %v1393_v46 = vpop.eup %1392 }
 0x261   : > { %v1395_v48 = vpop.eup %1394  ;;  %v1070_v49 = vcombine.low %v1389_v44, %v1393_v46 }
 0x262   : > { %v1071_v50 = vcombine.low %v1391_v45, %v1395_v48 }
 0x263   : > { %v1078_v51 = vrot.slane %v1070_v49, %v1708_v47 }
 0x264   : > { %v1085_v52 = vrot.slane %v1071_v50, %v1708_v47 }
 0x266   : > { %v1086_v53 = vcombine.low %v1078_v51, %v1085_v52 }
 0x268   : > { %v1088_v54 = vmul.f32 %v1086_v53, %v1889_v23 }
 0x26a   : > { %1089 = vst [vmem:[#allocation6] sm:$0xff] %v1088_v54 }
 0x26b PF: > { %p1336_p13 = scmp.eq.s32.totalorder %s1521_s22, 1  ;;  %s1471_s9 = smov [#allocation6]  }
 0x26c   : > { %s1097_s12 = sshll.u32 %s1471_s9, 4  ;;  %s1098_s12 = int_to_ptr.vmem [resolvable:$true] %s1097_s12 }
 0x26d   : > { %s1396_s13 = scalar_lea.vmem %s1098_s12, 128  ;;  %p1403_p3 = scmp.lt.s32.totalorder %s1098_s12, %s1098_s12 }
 0x26e   : > { %p1397_p0 = scmp.ne.s32.totalorder %s1098_s12, %s1396_s13  ;;  %p1404_p4 = scmp.lt.s32.totalorder %s1396_s13, %s1396_s13 }
 0x270   : > { %p1398_p1 = pnand %p1397_p0, %p1336_p13  ;;  %p1405_p5 = por %p1404_p4, %p1403_p3 }
 0x272   : > { %p1399_p2 = pneg %p1398_p1 }
 0x274   : > { %p1406_p6 = pnand %p1405_p5, %p1399_p2 }
 0x276   : > { %1409 = shalt.err (!%p1406_p6)
}
 0x277   : > { %s1410_s16 = scalar_lea.hbm %s2016_s5, 128 }
 0x278   : > { %p1411_p7 = scmp.ne.s32.totalorder %s2016_s5, %s1410_s16  ;;  %p1416_p10 = scmp.lt.u32.totalorder %s1410_s16, %s2016_s5 }
 0x27a   : > { %p1412_p8 = pnand %p1411_p7, %p1336_p13 }
 0x27c   : > { %p1413_p9 = pneg %p1412_p8 }
 0x27e   : > { %p1418_p11 = pnand %p1416_p10, %p1413_p9 }
 0x280   : > { %1421 = shalt.err (!%p1418_p11)
}
 0x281   : > { %1333 = dma.vmem_to_hbm [thread:$0]  (%p1336_p13), %s1098_s12, 128, %s2016_s5, [#allocation5]  }
 0x282   : > { %1443 = dma.done.wait (%p1336_p13), [#allocation5], 128  }
 0x283   : > { %1445 = vsyncadd (%p1336_p13), [#allocation5], 4294967168 }
 0x284 PF: > { %p16_p12 = scmp.ge.s32.totalorder %s1524_s23, 4   ;;  %s2019_s18 = smov %s1452_s19 }
 0x285   : > { %s2020_s19 = smov %s1456_s20  ;;  %s2021_s20 = smov %s1534_s26 }
 0x286   : > { %s2022_s21 = smov %s1524_s23  ;;  %18 = sbr.rel (!%p16_p12) target bundleno = 4 (0x4), region = 90 }
 0x28d   :  { %1110 = vsyncpa [#allocation4], 1 }
 0x28e   :  { %1112 = vsyncpa [#allocation4 + $0x1], 1 }
 0x28f   :  { %1113 = vsyncpa [#allocation5], 1 }
 0x290   :  { %1115 = vsyncpa [#allocation5 + $0x1], 1 }

</bundles_post_ra>
